<compile_context>
chip_gen: v7x
topology: tpu7x:2x2x1
jax: 0.10.0
libtpu: 0.0.40
codegen_flags: <defaults>
</compile_context>

<pallas_src>
import functools

import jax
import jax.numpy as jnp
from jax.experimental import pallas as pl
from jax.experimental.pallas import tpu as pltpu


def _feel_kernel(idx_ref, emb_ref, out_ref, acc_ref, *,
                 delta, seq_len, batch, v_tile):
    """One grid step processes one vocab tile of the embedding table.

    idx_ref : (3B, L) int32  -- [query; pos; neg] stacked, resident every step
    emb_ref : (tV, D)        -- current vocab tile, stored dtype (f32 or bf16)
    out_ref : (B, 128) f32   -- lane-dense hinge output, written on last step
    acc_ref : (3B, D) f32    -- VMEM scratch: running sum of embeddings
    """
    k = pl.program_id(0)
    n_k = pl.num_programs(0)

    @pl.when(k == 0)
    def _():
        acc_ref[...] = jnp.zeros_like(acc_ref)

    idx = idx_ref[...]                                    # (3B, L) int32
    nb = idx.shape[0]

    # counts[s, v] = #occurrences of global token (k*tV + v) in sequence s.
    # Single vectorized compare; the sum over L is a sublane (XLU) reduction.
    v_iota = jax.lax.broadcasted_iota(jnp.int32, (nb, seq_len, v_tile), 2)
    v_iota = v_iota + k * v_tile
    onehot = (idx[:, :, None] == v_iota).astype(jnp.float32)
    counts = jnp.sum(onehot, axis=1)                      # (3B, tV) f32

    # Partial sum-of-embeddings for this vocab tile on the MXU.
    # Table stays in its stored dtype (no f32 copy); cast counts at the input,
    # accumulate in f32.
    emb = emb_ref[...]                                    # (tV, D)
    acc_ref[...] += jnp.dot(counts.astype(emb.dtype), emb,
                            preferred_element_type=jnp.float32)

    @pl.when(k == n_k - 1)
    def _():
        means = acc_ref[...] * (1.0 / seq_len)            # (3B, D) f32
        q_m = means[0 * batch:1 * batch, :]
        p_m = means[1 * batch:2 * batch, :]
        n_m = means[2 * batch:3 * batch, :]
        a = jnp.sum(q_m * p_m, axis=-1, keepdims=True)    # (B, 1)
        b = jnp.sum(q_m * n_m, axis=-1, keepdims=True)    # (B, 1)
        hinge = jnp.maximum(delta - a + b, 0.0)           # (B, 1)
        # Lane-dense store (unmasked vst); wrapper reads column 0.
        out_ref[...] = jnp.broadcast_to(hinge, out_ref.shape)


def feel_forward(query, pos, neg, embeddings, delta=1.0, v_tile=512):
    """Pallas equivalent of FEELModel.forward((query, pos, neg))."""
    B, L = query.shape
    V, D = embeddings.shape
    NB = 3 * B

    # Stack the three sequence sets -> one matmul per vocab tile.
    idx = jnp.concatenate([query, pos, neg], axis=0).astype(jnp.int32)  # (3B, L)

    # Vocab tile: multiple of 8 sublanes (MXU K chunk ~256-512 for real vocabs).
    tV = min(int(v_tile), V)
    tV = max(8, (tV // 8) * 8)
    V_pad = pl.cdiv(V, tV) * tV
    if V_pad != V:
        # Zero rows never match any index (< V), so padding is exact.
        embeddings = jnp.pad(embeddings, ((0, V_pad - V), (0, 0)))
    num_tiles = V_pad // tV

    kernel = functools.partial(_feel_kernel, delta=float(delta),
                               seq_len=L, batch=B, v_tile=tV)

    out = pl.pallas_call(
        kernel,
        out_shape=jax.ShapeDtypeStruct((B, 128), jnp.float32),
        grid_spec=pltpu.PrefetchScalarGridSpec(
            num_scalar_prefetch=0,
            grid=(num_tiles,),                             # reduction over vocab tiles
            in_specs=[
                pl.BlockSpec((NB, L), lambda k: (0, 0)),   # indices: resident
                pl.BlockSpec((tV, D), lambda k: (k, 0)),   # table: streamed over V
            ],
            out_specs=pl.BlockSpec((B, 128), lambda k: (0, 0)),
            scratch_shapes=[pltpu.VMEM((NB, D), jnp.float32)],
        ),
        compiler_params=pltpu.CompilerParams(
            dimension_semantics=("arbitrary",),            # vocab axis is a reduction
            vmem_limit_bytes=48 * 1024 * 1024,             # headroom below v7x 64 MiB
        ),
    )(idx, embeddings)
    return out[:, 0]                                       # (B,) to match PyTorch


def feel_forward_ref(query, pos, neg, embeddings, delta=1.0):
    """Pure-JAX reference of the PyTorch forward for validation."""
    emb = embeddings.astype(jnp.float32)
    q = emb[query].mean(axis=1)
    p = emb[pos].mean(axis=1)
    n = emb[neg].mean(axis=1)
    a = jnp.sum(q * p, axis=1)
    b = jnp.sum(q * n, axis=1)
    return jnp.maximum(delta - a + b, 0.0)


if __name__ == "__main__":
    B, L, V, D = 4, 8, 64, 32
    delta = 1.0

    key = jax.random.PRNGKey(0)
    k_emb, k_q, k_p, k_n = jax.random.split(key, 4)

    # Deterministic synthetic embedding table (matches nn.Embedding(V, D)).
    embeddings = jax.random.normal(k_emb, (V, D), dtype=jnp.float32)
    query = jax.random.randint(k_q, (B, L), 0, V, dtype=jnp.int32)
    pos = jax.random.randint(k_p, (B, L), 0, V, dtype=jnp.int32)
    neg = jax.random.randint(k_n, (B, L), 0, V, dtype=jnp.int32)

    ref = feel_forward_ref(query, pos, neg, embeddings, delta)

    # 1) f32 table, single vocab tile.
    out = jax.block_until_ready(feel_forward(query, pos, neg, embeddings, delta))
    assert out.shape == (B,)
    assert jnp.allclose(out, ref, atol=1e-4, rtol=1e-4), (out, ref)

    # 2) Multi-tile accumulation path (V split into 4 tiles of 16 rows).
    out_tiled = jax.block_until_ready(
        feel_forward(query, pos, neg, embeddings, delta, v_tile=16))
    assert jnp.allclose(out_tiled, ref, atol=1e-4, rtol=1e-4), (out_tiled, ref)

    # 3) bf16 table path (half the VMEM/HBM traffic, native MXU dtype).
    emb_bf16 = embeddings.astype(jnp.bfloat16)
    out_bf16 = jax.block_until_ready(
        feel_forward(query, pos, neg, emb_bf16, delta))
    ref_bf16 = feel_forward_ref(query, pos, neg, emb_bf16, delta)
    assert jnp.allclose(out_bf16, ref_bf16, atol=2e-2, rtol=2e-2), (out_bf16, ref_bf16)

    print("KERNEL_OK")
</pallas_src>

<mosaic_0001>
module attributes {stable_mosaic.version = 11 : i64} {
  func.func @_feel_kernel(%arg0: i32, %arg1: memref<12x8xi32, #tpu.memory_space<vmem>>, %arg2: memref<64x32xf32, #tpu.memory_space<vmem>>, %arg3: memref<4x128xf32, #tpu.memory_space<vmem>>, %arg4: memref<12x32xf32, #tpu.memory_space<vmem>>) attributes {dimension_semantics = [#tpu.dimension_semantics<arbitrary>], iteration_bounds = array<i64: 1>, scalar_prefetch = 0 : i64, scratch_operands = 1 : i64, tpu.core_type = #tpu.core_type<tc>, window_params = [{pipeline_mode = #tpu.pipeline_mode<synchronous>, transform_indices = @transform_0, window_bounds = array<i64: 12, 8>}, {transform_indices = @transform_1, window_bounds = array<i64: 64, 32>}, {pipeline_mode = #tpu.pipeline_mode<synchronous>, transform_indices = @transform_2, window_bounds = array<i64: 4, 128>}]} {
    %c0_i32 = arith.constant 0 : i32
    %0 = arith.cmpi eq, %arg0, %c0_i32 : i32
    %1 = arith.extui %0 : i1 to i32
    %c0_i32_0 = arith.constant 0 : i32
    %2 = arith.cmpi ne, %1, %c0_i32_0 : i32
    scf.if %2 {
      %cst_11 = arith.constant 0.000000e+00 : f32
      %22 = vector.broadcast %cst_11 : f32 to vector<12x32xf32>
      %c0_12 = arith.constant 0 : index
      %c0_13 = arith.constant 0 : index
      %23 = vector.load %arg4[%c0_12, %c0_13] : memref<12x32xf32, #tpu.memory_space<vmem>>, vector<12x32xf32>
      tpu.vector_store %arg4[%c0_12, %c0_13], %22 {strides = array<i32>} : memref<12x32xf32, #tpu.memory_space<vmem>>, vector<12x32xf32>,
    } else {
    }
    %c0 = arith.constant 0 : index
    %c0_1 = arith.constant 0 : index
    %3 = vector.load %arg1[%c0, %c0_1] : memref<12x8xi32, #tpu.memory_space<vmem>>, vector<12x8xi32>
    %4 = tpu.iota {dimensions = array<i32: 2>} : vector<12x8x64xi32>
    %c64_i32 = arith.constant 64 : i32
    %5 = arith.muli %arg0, %c64_i32 : i32
    %6 = vector.broadcast %5 : i32 to vector<12x8x64xi32>
    %7 = arith.addi %4, %6 : vector<12x8x64xi32>
    %8 = vector.shape_cast %3 : vector<12x8xi32> to vector<12x8x1xi32>
    %9 = vector.broadcast %8 : vector<12x8x1xi32> to vector<12x8x64xi32>
    %10 = arith.cmpi eq, %9, %7 : vector<12x8x64xi32>
    %11 = arith.extui %10 : vector<12x8x64xi1> to vector<12x8x64xi32>
    %12 = arith.sitofp %11 : vector<12x8x64xi32> to vector<12x8x64xf32>
    %cst = arith.constant dense<0.000000e+00> : vector<12x64xf32>
    %13 = vector.multi_reduction <add>, %12, %cst [1] : vector<12x8x64xf32> to vector<12x64xf32>
    %c0_2 = arith.constant 0 : index
    %c0_3 = arith.constant 0 : index
    %14 = vector.load %arg2[%c0_2, %c0_3] : memref<64x32xf32, #tpu.memory_space<vmem>>, vector<64x32xf32>
    %c0_4 = arith.constant 0 : index
    %c0_5 = arith.constant 0 : index
    %15 = vector.load %arg4[%c0_4, %c0_5] : memref<12x32xf32, #tpu.memory_space<vmem>>, vector<12x32xf32>
    %cst_6 = arith.constant dense<0.000000e+00> : vector<12x32xf32>
    %16 = tpu.matmul %13, %14, %cst_6 {dimension_numbers = #tpu.dot_dimension_numbers<[1], [0], [0], [1], [0, 0, 1, 1], [], []>} : vector<12x64xf32>, vector<64x32xf32>, vector<12x32xf32> -> vector<12x32xf32>
    %17 = arith.addf %15, %16 : vector<12x32xf32>
    %c0_7 = arith.constant 0 : index
    %c0_8 = arith.constant 0 : index
    %18 = vector.load %arg4[%c0_7, %c0_8] : memref<12x32xf32, #tpu.memory_space<vmem>>, vector<12x32xf32>
    tpu.vector_store %arg4[%c0_7, %c0_8], %17 {strides = array<i32>} : memref<12x32xf32, #tpu.memory_space<vmem>>, vector<12x32xf32>,
    %c0_i32_9 = arith.constant 0 : i32
    %19 = arith.cmpi eq, %arg0, %c0_i32_9 : i32
    %20 = arith.extui %19 : i1 to i32
    %c0_i32_10 = arith.constant 0 : i32
    %21 = arith.cmpi ne, %20, %c0_i32_10 : i32
    scf.if %21 {
      %c0_11 = arith.constant 0 : index
      %c0_12 = arith.constant 0 : index
      %22 = vector.load %arg4[%c0_11, %c0_12] : memref<12x32xf32, #tpu.memory_space<vmem>>, vector<12x32xf32>
      %cst_13 = arith.constant 1.250000e-01 : f32
      %23 = vector.broadcast %cst_13 : f32 to vector<12x32xf32>
      %24 = arith.mulf %22, %23 : vector<12x32xf32>
      %25 = vector.extract_strided_slice %24 {offsets = [0, 0], sizes = [4, 32], strides = [1, 1]} : vector<12x32xf32> to vector<4x32xf32>
      %26 = vector.extract_strided_slice %24 {offsets = [4, 0], sizes = [4, 32], strides = [1, 1]} : vector<12x32xf32> to vector<4x32xf32>
      %27 = vector.extract_strided_slice %24 {offsets = [8, 0], sizes = [4, 32], strides = [1, 1]} : vector<12x32xf32> to vector<4x32xf32>
      %28 = arith.mulf %25, %26 : vector<4x32xf32>
      %cst_14 = arith.constant dense<0.000000e+00> : vector<4xf32>
      %29 = vector.multi_reduction <add>, %28, %cst_14 [1] : vector<4x32xf32> to vector<4xf32>
      %30 = vector.shape_cast %29 : vector<4xf32> to vector<4x1xf32>
      %31 = arith.mulf %25, %27 : vector<4x32xf32>
      %cst_15 = arith.constant dense<0.000000e+00> : vector<4xf32>
      %32 = vector.multi_reduction <add>, %31, %cst_15 [1] : vector<4x32xf32> to vector<4xf32>
      %33 = vector.shape_cast %32 : vector<4xf32> to vector<4x1xf32>
      %cst_16 = arith.constant 1.000000e+00 : f32
      %34 = vector.broadcast %cst_16 : f32 to vector<4x1xf32>
      %35 = arith.subf %34, %30 : vector<4x1xf32>
      %36 = arith.addf %35, %33 : vector<4x1xf32>
      %cst_17 = arith.constant 0.000000e+00 : f32
      %37 = vector.broadcast %cst_17 : f32 to vector<4x1xf32>
      %38 = arith.maximumf %36, %37 : vector<4x1xf32>
      %39 = vector.shape_cast %38 : vector<4x1xf32> to vector<4x1xf32>
      %40 = vector.broadcast %39 : vector<4x1xf32> to vector<4x128xf32>
      %c0_18 = arith.constant 0 : index
      %c0_19 = arith.constant 0 : index
      %41 = vector.load %arg3[%c0_18, %c0_19] : memref<4x128xf32, #tpu.memory_space<vmem>>, vector<4x128xf32>
      tpu.vector_store %arg3[%c0_18, %c0_19], %40 {strides = array<i32>} : memref<4x128xf32, #tpu.memory_space<vmem>>, vector<4x128xf32>,
    } else {
    }
    return
  }
  func.func @transform_0(%arg0: i32) -> (i32, i32) {
    %c0_i32 = arith.constant 0 : i32
    %c0_i32_0 = arith.constant 0 : i32
    %c0_i32_1 = arith.constant 0 : i32
    return %c0_i32, %c0_i32_0 : i32, i32
  }
  func.func @transform_1(%arg0: i32) -> (i32, i32) {
    %c0_i32 = arith.constant 0 : i32
    %c0_i32_0 = arith.constant 0 : i32
    return %arg0, %c0_i32 : i32, i32
  }
  func.func @transform_2(%arg0: i32) -> (i32, i32) {
    %c0_i32 = arith.constant 0 : i32
    %c0_i32_0 = arith.constant 0 : i32
    %c0_i32_1 = arith.constant 0 : i32
    return %c0_i32, %c0_i32_0 : i32, i32
  }
}

</mosaic_0001>

<bundles_post_ra>
// kernel: tpu_custom_call.1
= control target key start
LH: loop header
LB: loop body
LE: loop exit
PB: predicated region body
PF: predicated region fallthrough
CT: control target
= control target key end

     0   :  { %v22_v0 = vlaneseq  ;;  %s589_s0 = inlined_call_operand.vmem [shape: s32[12,8], index: 0, kind: input, shape index: {}]   ;;  %s590_s1 = inlined_call_operand.vmem [shape: f32[64,32], index: 1, kind: input, shape index: {}]   ;;  %s591_s2 = inlined_call_operand.hbm [shape: f32[4,128], index: 2, kind: output, shape index: {}]  }
   0x1   :  { %7 = vsyncpa [#allocation4], 0  ;;  %v20_v2 = vld [vmem:[%s589_s0] sm:$0xff]  ;;  %v21_v16 = vld [vmem:[%s589_s0 + $0x8] sm:$0xf]  ;;  %vm18_vm0 = vcmask 257024  }
   0x2   :  { %v28_v1 = vshrl.u32 %v22_v0, 7  ;;  %v232_v20 = vld [vmem:[%s590_s1] sm:$0xff]  ;;  %v233_v21 = vld [vmem:[%s590_s1 + $0x8] sm:$0xff]  ;;  %v234_v25 = vld [vmem:[%s590_s1 + $0x10] sm:$0xff]  ;;  %v477_v36 = vmov 0.0   ;;  %v526_v37 = vand.u32 127, %v22_v0 }
   0x3   :  { %v435_v22 = vpack.c.bf16 %v233_v21, %v232_v20  ;;  %v235_v26 = vld [vmem:[%s590_s1 + $0x18] sm:$0xff]  ;;  %v236_v30 = vld [vmem:[%s590_s1 + $0x20] sm:$0xff]  ;;  %v237_v31 = vld [vmem:[%s590_s1 + $0x28] sm:$0xff]  ;;  %19 = vst.msk [vmem:[#allocation2 + $0x8] sm:$0xf] %vm18_vm0, %v477_v36  ;;  %vm147_vm1 = vcmask 523264  }
   0x4   :  { %v43_v3 = vsub.s32 2, %v28_v1  ;;  %v29_v4 = vsub.s32 0, %v28_v1  ;;  %v50_v5 = vsub.s32 3, %v28_v1  ;;  %v36_v6 = vsub.s32 1, %v28_v1  ;;  %v238_v33 = vld [vmem:[%s590_s1 + $0x30] sm:$0xff]  ;;  %v239_v34 = vld [vmem:[%s590_s1 + $0x38] sm:$0xff] }
   0x5   :  { %v64_v11 = vsub.s32 5, %v28_v1  ;;  %v57_v12 = vsub.s32 4, %v28_v1  ;;  %v71_v15 = vsub.s32 6, %v28_v1  ;;  %v78_v19 = vsub.s32 7, %v28_v1  ;;  %436 = vmatprep.subr.bf16.mxu0 %v435_v22  ;;  %s478_s1 = smov [#allocation3]  }
   0x6   :  { %v44_v7 = vrot.slane %v20_v2, %v43_v3  ;;  %v30_v8 = vrot.slane %v20_v2, %v29_v4  ;;  %v51_v9 = vrot.slane %v20_v2, %v50_v5  ;;  %v37_v10 = vrot.slane %v20_v2, %v36_v6  ;;  %438 = vmatpush3.bf16.msra.mxu0 %v435_v22  ;;  %s384_s28 = sshll.u32 %s478_s1, 4  ;;  %s385_s28 = int_to_ptr.vmem [resolvable:$true] %s384_s28 }
   0x7   :  { %v65_v13 = vrot.slane %v20_v2, %v64_v11  ;;  %v58_v14 = vrot.slane %v20_v2, %v57_v12  ;;  %v86_v17 = vrot.slane %v21_v16, %v29_v4  ;;  %v72_v18 = vrot.slane %v20_v2, %v71_v15  ;;  %s453_s29 = scalar_lea.vmem %s385_s28, 64  ;;  %p458_p1 = scmp.lt.s32.totalorder %s385_s28, %s385_s28 }
   0x8   :  { %46 = vbcast.lane.b32.xlu1 %v44_v7, 256  ;;  %32 = vbcast.lane.b32.xlu0 %v30_v8, 256  ;;  %v79_v23 = vrot.slane %v20_v2, %v78_v19  ;;  %v93_v24 = vrot.slane %v21_v16, %v36_v6  ;;  %v439_v27 = vpack.c.bf16 %v235_v26, %v234_v25  ;;  %vm254_vm10 = vcmask 1041409   ;;  %p454_p0 = scmp.ne.s32.totalorder %s385_s28, %s453_s29  ;;  %p459_p2 = scmp.lt.s32.totalorder %s453_s29, %s453_s29 }
   0x9   :  { %v107_v28 = vrot.slane %v21_v16, %v50_v5  ;;  %v100_v29 = vrot.slane %v21_v16, %v43_v3  ;;  %v443_v32 = vpack.c.bf16 %v237_v31, %v236_v30  ;;  %v447_v35 = vpack.c.bf16 %v239_v34, %v238_v33 }
   0xa   :  { %440 = vmatprep.subr.bf16.mxu0 %v439_v27  ;;  %vm256_vm11 = vcmask 1042434   ;;  %vm258_vm14 = vcmask 1043459   ;;  %vm260_vm15 = vcmask 1044484   ;;  %p460_p3 = por %p459_p2, %p458_p1 }
   0xb   :  { %442 = vmatpush3.bf16.msra.mxu0 %v439_v27 }
   0xc   :  { %53 = vbcast.lane.b32.xlu1 %v51_v9, 256  ;;  %39 = vbcast.lane.b32.xlu0 %v37_v10, 256  ;;  %p461_p4 = pnand %p460_p3, %p454_p0 }
   0xd   :  { %444 = vmatprep.subr.bf16.mxu0 %v443_v32 }
   0xf   :  { %446 = vmatpush3.bf16.msra.mxu0 %v443_v32 }
  0x10   :  { %67 = vbcast.lane.b32.xlu1 %v65_v13, 256  ;;  %60 = vbcast.lane.b32.xlu0 %v58_v14, 256 }
  0x11   :  { %448 = vmatprep.subr.bf16.mxu0 %v447_v35 }
  0x13   :  { %450 = vmatpush3.bf16.msra.mxu0 %v447_v35 }
  0x14   :  { %88 = vbcast.lane.b32.xlu1 %v86_v17, 256  ;;  %74 = vbcast.lane.b32.xlu0 %v72_v18, 256 }
  0x18   :  { %81 = vbcast.lane.b32.xlu1 %v79_v23, 256  ;;  %95 = vbcast.lane.b32.xlu0 %v93_v24, 256 }
  0x1c   :  { %109 = vbcast.lane.b32.xlu1 %v107_v28, 256  ;;  %102 = vbcast.lane.b32.xlu0 %v100_v29, 256 }
  0x7a   :  { %v47_v38 = vpop.permute.xlu1 %46  ;;  %v33_v39 = vpop.permute.xlu0 %32 }
  0x7b   :  { %vm113_vm2 = vcmp.eq.s32.totalorder %v47_v38, %v526_v37  ;;  %vm111_vm3 = vcmp.eq.s32.totalorder %v33_v39, %v526_v37 }
  0x7c   :  { %v394_v40 = vsel %vm113_vm2, 1.0, %v477_v36  ;;  %v392_v41 = vsel %vm111_vm3, 1.0, %v477_v36 }
  0x7d   :  { %v162_v42 = vsel %vm147_vm1, %v394_v40, 0.0  ;;  %v148_v43 = vsel %vm147_vm1, %v392_v41, 0.0 }
  0x7e   :  { %v163_v44 = vrot.slane %v162_v42, 4  ;;  %v149_v45 = vrot.slane %v148_v43, 4  ;;  %v54_v46 = vpop.permute.xlu1 %53  ;;  %v40_v47 = vpop.permute.xlu0 %39 }
  0x7f   :  { %vm114_vm4 = vcmp.eq.s32.totalorder %v54_v46, %v526_v37  ;;  %vm112_vm5 = vcmp.eq.s32.totalorder %v40_v47, %v526_v37 }
  0x80   :  { %v164_v48 = vadd.f32 %v163_v44, %v162_v42  ;;  %v150_v49 = vadd.f32 %v149_v45, %v148_v43  ;;  %v395_v50 = vsel %vm114_vm4, 1.0, %v477_v36  ;;  %v393_v51 = vsel %vm112_vm5, 1.0, %v477_v36 }
  0x81   :  { %v169_v52 = vsel %vm147_vm1, %v395_v50, 0.0  ;;  %v155_v53 = vsel %vm147_vm1, %v393_v51, 0.0  ;;  %vm262_vm4 = vcmask 1045509   ;;  %vm264_vm5 = vcmask 1046534  }
  0x82   :  { %v170_v54 = vrot.slane %v169_v52, 4  ;;  %v156_v55 = vrot.slane %v155_v53, 4  ;;  %v68_v56 = vpop.permute.xlu1 %67  ;;  %v61_v57 = vpop.permute.xlu0 %60  ;;  %v165_v58 = vrot.slane %v164_v48, 2  ;;  %v151_v59 = vrot.slane %v150_v49, 2 }
  0x83   :  { %vm116_vm6 = vcmp.eq.s32.totalorder %v68_v56, %v526_v37  ;;  %vm115_vm7 = vcmp.eq.s32.totalorder %v61_v57, %v526_v37 }
  0x84   :  { %v171_v60 = vadd.f32 %v170_v54, %v169_v52  ;;  %v157_v61 = vadd.f32 %v156_v55, %v155_v53  ;;  %v397_v62 = vsel %vm116_vm6, 1.0, %v477_v36  ;;  %v396_v63 = vsel %vm115_vm7, 1.0, %v477_v36 }
  0x85   :  { %v183_v4 = vsel %vm147_vm1, %v397_v62, 0.0  ;;  %v176_v5 = vsel %vm147_vm1, %v396_v63, 0.0  ;;  %v166_v6 = vadd.f32 %v165_v58, %v164_v48  ;;  %v152_v7 = vadd.f32 %v151_v59, %v150_v49 }
  0x86   :  { %v172_v0 = vrot.slane %v171_v60, 2  ;;  %v158_v1 = vrot.slane %v157_v61, 2  ;;  %v89_v2 = vpop.permute.xlu1 %88  ;;  %v75_v3 = vpop.permute.xlu0 %74  ;;  %v184_v9 = vrot.slane %v183_v4, 4  ;;  %v177_v10 = vrot.slane %v176_v5, 4 }
  0x87   :  { %vm119_vm8 = vcmp.eq.s32.totalorder %v89_v2, %v526_v37  ;;  %vm117_vm9 = vcmp.eq.s32.totalorder %v75_v3, %v526_v37  ;;  %v153_v23 = vrot.slane %v152_v7, 1  ;;  %v167_v28 = vrot.slane %v166_v6, 1 }
  0x88   :  { %v159_v8 = vadd.f32 %v158_v1, %v157_v61  ;;  %v400_v11 = vsel %vm119_vm8, 1.0, %v477_v36  ;;  %v398_v12 = vsel %vm117_vm9, 1.0, %v477_v36  ;;  %v173_v13 = vadd.f32 %v172_v0, %v171_v60 }
  0x89   :  { %v204_v15 = vsel %vm147_vm1, %v400_v11, 0.0  ;;  %v190_v16 = vsel %vm147_vm1, %v398_v12, 0.0  ;;  %v185_v19 = vadd.f32 %v184_v9, %v183_v4  ;;  %v178_v20 = vadd.f32 %v177_v10, %v176_v5 }
  0x8a   :  { %v160_v14 = vrot.slane %v159_v8, 1  ;;  %v82_v17 = vpop.permute.xlu1 %81  ;;  %v96_v18 = vpop.permute.xlu0 %95  ;;  %v205_v21 = vrot.slane %v204_v15, 4  ;;  %v191_v22 = vrot.slane %v190_v16, 4  ;;  %v174_v29 = vrot.slane %v173_v13, 1 }
  0x8b   :  { %vm118_vm12 = vcmp.eq.s32.totalorder %v82_v17, %v526_v37  ;;  %vm120_vm13 = vcmp.eq.s32.totalorder %v96_v18, %v526_v37  ;;  %v186_v24 = vrot.slane %v185_v19, 2  ;;  %v179_v25 = vrot.slane %v178_v20, 2 }
  0x8c   :  { %v206_v26 = vadd.f32 %v205_v21, %v204_v15  ;;  %v192_v27 = vadd.f32 %v191_v22, %v190_v16  ;;  %v399_v30 = vsel %vm118_vm12, 1.0, %v477_v36  ;;  %v401_v31 = vsel %vm120_vm13, 1.0, %v477_v36 }
  0x8d   :  { %v161_v34 = vadd.f32 %v160_v14, %v159_v8  ;;  %v187_v35 = vadd.f32 %v186_v24, %v185_v19  ;;  %v180_v38 = vadd.f32 %v179_v25, %v178_v20  ;;  %v197_v40 = vsel %vm147_vm1, %v399_v30, 0.0 }
  0x8e   :  { %v110_v32 = vpop.permute.xlu1 %109  ;;  %v103_v33 = vpop.permute.xlu0 %102  ;;  %v193_v39 = vrot.slane %v192_v27, 2  ;;  %v211_v41 = vsel %vm147_vm1, %v401_v31, 0.0  ;;  %v154_v42 = vadd.f32 %v153_v23, %v152_v7  ;;  %v207_v44 = vrot.slane %v206_v26, 2 }
  0x8f   :  { %vm122_vm2 = vcmp.eq.s32.totalorder %v110_v32, %v526_v37  ;;  %vm121_vm3 = vcmp.eq.s32.totalorder %v103_v33, %v526_v37  ;;  %v181_v43 = vrot.slane %v180_v38, 1  ;;  %v198_v46 = vrot.slane %v197_v40, 4 }
  0x90   :  { %v194_v45 = vadd.f32 %v193_v39, %v192_v27  ;;  %v212_v47 = vrot.slane %v211_v41, 4  ;;  %v403_v48 = vsel %vm122_vm2, 1.0, %v477_v36  ;;  %v402_v49 = vsel %vm121_vm3, 1.0, %v477_v36 }
  0x91   :  { %v168_v50 = vadd.f32 %v167_v28, %v166_v6  ;;  %v175_v51 = vadd.f32 %v174_v29, %v173_v13  ;;  %v255_v52 = vsel %vm254_vm10, %v161_v34, %v154_v42  ;;  %v188_v53 = vrot.slane %v187_v35, 1  ;;  %v241_v29 = vld [vmem:[#allocation2 + $0x8] sm:$0xf] }
  0x92   :  { %v199_v54 = vadd.f32 %v198_v46, %v197_v40  ;;  %v213_v55 = vadd.f32 %v212_v47, %v211_v41  ;;  %v225_v56 = vsel %vm147_vm1, %v403_v48, 0.0  ;;  %v218_v37 = vsel %vm147_vm1, %v402_v49, 0.0 }
  0x93   :  { %v182_v57 = vadd.f32 %v181_v43, %v180_v38  ;;  %v195_v58 = vrot.slane %v194_v45, 1  ;;  %v226_v59 = vrot.slane %v225_v56, 4  ;;  %v219_v60 = vrot.slane %v218_v37, 4 }
  0x94   :  { %v208_v61 = vadd.f32 %v207_v44, %v206_v26  ;;  %v200_v62 = vrot.slane %v199_v54, 2  ;;  %v214_v63 = vrot.slane %v213_v55, 2  ;;  %v257_v0 = vsel %vm256_vm11, %v168_v50, %v255_v52 }
  0x95   :  { %v227_v1 = vadd.f32 %v226_v59, %v225_v56  ;;  %v220_v2 = vadd.f32 %v219_v60, %v218_v37  ;;  %v259_v3 = vsel %vm258_vm14, %v175_v51, %v257_v0  ;;  %v189_v4 = vadd.f32 %v188_v53, %v187_v35 }
  0x96   :  { %v201_v5 = vadd.f32 %v200_v62, %v199_v54  ;;  %v215_v6 = vadd.f32 %v214_v63, %v213_v55  ;;  %v196_v9 = vadd.f32 %v195_v58, %v194_v45  ;;  %v261_v10 = vsel %vm260_vm15, %v182_v57, %v259_v3 }
  0x97   :  { %v228_v7 = vrot.slane %v227_v1, 2  ;;  %v221_v8 = vrot.slane %v220_v2, 2  ;;  %v209_v11 = vrot.slane %v208_v61, 1  ;;  %vm266_vm6 = vcmask 1047559  }
  0x98   :  { %v216_v12 = vrot.slane %v215_v6, 1  ;;  %v202_v13 = vrot.slane %v201_v5, 1  ;;  %v263_v18 = vsel %vm262_vm4, %v189_v4, %v261_v10  ;;  %vm16_vm7 = vcmask 261120  }
  0x99   :  { %v229_v14 = vadd.f32 %v228_v7, %v227_v1  ;;  %v222_v15 = vadd.f32 %v221_v8, %v220_v2  ;;  %v265_v21 = vsel %vm264_vm5, %v196_v9, %v263_v18  ;;  %v210_v22 = vadd.f32 %v209_v11, %v208_v61  ;;  %17 = vst.msk [vmem:[#allocation2] sm:$0xff] %vm16_vm7, %v477_v36 }
  0x9a   :  { %v217_v16 = vadd.f32 %v216_v12, %v215_v6  ;;  %v203_v17 = vadd.f32 %v202_v13, %v201_v5 }
  0x9b   :  { %v230_v19 = vrot.slane %v229_v14, 1  ;;  %v223_v20 = vrot.slane %v222_v15, 1 }
  0x9c   :  { %v267_v23 = vsel %vm266_vm6, %v203_v17, %v265_v21  ;;  %v268_v26 = vsel %vm254_vm10, %v217_v16, %v210_v22 }
  0x9d   :  { %v231_v24 = vadd.f32 %v230_v19, %v229_v14  ;;  %v224_v25 = vadd.f32 %v223_v20, %v222_v15  ;;  %432 = vmatprep.mubr.msk.f32.mxu0 %vm147_vm1, %v267_v23 }
  0x9f   :  { %v269_v27 = vsel %vm256_vm11, %v224_v25, %v268_v26 }
  0xa0   :  { %v270_v28 = vsel %vm258_vm14, %v231_v24, %v269_v27  ;;  %v240_v30 = vld [vmem:[#allocation2] sm:$0xff] }
  0xa1   :  { %433 = vmatmul.mubr.msk.f32.vlgmr.msra.gmra.mrb[0].mxu0 %vm147_vm1, %v270_v28 }
 0x174   :  { %v434_v31 = vpop.f32.mrb[0].mxu0 }
 0x175   :  { %v351_v32 = vadd.f32 %v434_v31, %v241_v29  ;;  %v341_v33 = vpop.f32.mrb[1].mxu0 }
 0x176   :  { %v350_v34 = vadd.f32 %v341_v33, %v240_v30 }
 0x177   :  { %355 = vst.msk [vmem:[#allocation2 + $0x8] sm:$0xf] %vm18_vm0, %v351_v32 }
 0x178   :  { %353 = vst.msk [vmem:[#allocation2] sm:$0xff] %vm16_vm7, %v350_v34 }
 0x17e   :  { %v360_v35 = vld [vmem:[#allocation2 + $0x8] sm:$0xf] }
 0x17f   :  { %v359_v38 = vld [vmem:[#allocation2] sm:$0xff]  ;;  %v362_v39 = vmul.f32 0.125, %v360_v35 }
 0x180   :  { %v361_v40 = vmul.f32 0.125, %v359_v38 }
 0x182   :  { %v370_v41 = vmul.f32 %v362_v39, %v361_v40  ;;  %v364_v42 = vrot.slane %v361_v40, 4 }
 0x184   :  { %v371_v43 = vsel %vm18_vm0, %v370_v41, 0.0  ;;  %v366_v44 = vmul.f32 %v364_v42, %v361_v40 }
 0x185   :  { %372 = vadd.xlane.f32.xlu1 %v371_v43 }
 0x186   :  { %v367_v36 = vsel %vm18_vm0, %v366_v44, 0.0 }
 0x187   :  { %368 = vadd.xlane.f32.xlu0 %v367_v36 }
 0x212   :  { %v373_v47 = vpop.xlane.xlu1 %372 }
 0x214   :  { %v369_v45 = vpop.xlane.xlu0 %368 }
 0x215   :  { %v374_v46 = vsub.f32 1.0, %v369_v45 }
 0x217   :  { %v375_v48 = vadd.f32 %v374_v46, %v373_v47 }
 0x219   :  { %v376_v49 = vmax.f32 %v375_v48, 0.0 }
 0x21b   :  { %377 = vst [vmem:[#allocation3] sm:$0xf] %v376_v49 }
 0x21c   :  { %464 = shalt.err (!%p461_p4)
}
 0x21d   :  { %s465_s4 = scalar_lea.hbm %s591_s2, 64 }
 0x21e   :  { %p466_p5 = scmp.ne.s32.totalorder %s591_s2, %s465_s4  ;;  %p469_p6 = scmp.lt.u32.totalorder %s465_s4, %s591_s2 }
 0x220   :  { %p471_p7 = pnand %p469_p6, %p466_p5 }
 0x222   :  { %474 = shalt.err (!%p471_p7)
}
 0x223   :  { %387 = dma.vmem_to_hbm [thread:$0]  %s385_s28, 64, %s591_s2, [#allocation4]  }
 0x224   :  { %475 = dma.done.wait [#allocation4], 64  }
 0x225   :  { %476 = vsyncadd [#allocation4], 4294967232 }
 0x226   :  { %391 = vsyncpa [#allocation4], 1 }

</bundles_post_ra>
